<compile_context>
chip_gen: v5e
topology: v5e:2x2
jax: 0.10.0
libtpu: 0.0.40
codegen_flags: <defaults>
</compile_context>

<pallas_src>
import jax
import jax.numpy as jnp
from jax import lax
from jax.experimental import pallas as pl
from jax.experimental.pallas import tpu as pltpu


H1 = 64
H2 = 32


def ranknet_kernel(x_ref, w1_ref, b1_ref, w2_ref, b2_ref, w3_ref, b3_ref, out_ref):
    # x_ref: [tm, F] f32, natural HBM layout (batch-major).  Weights resident in VMEM.
    ew = b1_ref.dtype                       # bf16 on v6e/v7x, f32 on v5e
    xb = x_ref[...].astype(jnp.bfloat16)    # [tm, F] bf16

    # Linear(F, 64): contract F of both operands (A @ B^T pattern); the on-chip
    # relayout of x replaces the old wrapper-side HBM transpose pass.
    h1 = lax.dot_general(w1_ref[...], xb, (((1,), (1,)), ((), ())),
                         preferred_element_type=jnp.float32)          # [H1, tm] f32
    h1 = jnp.maximum(h1.astype(ew) + b1_ref[...], 0).astype(jnp.bfloat16)

    # Linear(64, 32)
    h2 = jnp.dot(w2_ref[...], h1, preferred_element_type=jnp.float32)  # [H2, tm] f32
    h2 = jnp.maximum(h2.astype(ew) + b2_ref[...], 0).astype(jnp.bfloat16)

    # Linear(32, 1) on the MXU: w3 is zero-padded to 8 output rows (row 0 real),
    # so the 1-wide output never hits a degenerate MXU tile and the VPU/XLU
    # reduce is avoided.
    s = jnp.dot(w3_ref[...], h2, preferred_element_type=jnp.float32)   # [8, tm] f32
    out_ref[...] = (s[0:1, :] + b3_ref[...]).astype(out_ref.dtype)     # [1, tm]


def _elementwise_dtype():
    """bf16 elementwise on v6e/v7x (bf16 VALU); f32 on v5e and older."""
    try:
        kind = jax.devices()[0].device_kind.lower()
    except Exception:
        return jnp.float32
    return jnp.bfloat16 if ("v6" in kind or "v7" in kind) else jnp.float32


def _round_up(n, m):
    return ((n + m - 1) // m) * m


def _choose_tile(B, F, requested_tm):
    """Pick the batch tile: lane-dense, VMEM-budgeted, >=2 grid steps when possible."""
    if B < 256:
        # Single grid step covering the whole (small) batch.
        return max(8, _round_up(B, 8))
    tm = max(128, (int(requested_tm) // 128) * 128)
    # VMEM budget (~20 MiB): f32 x double-buffer + in-kernel bf16 copy/relayout
    # + f32/ew h1,h2 temporaries.  Keeps us inside v7x's 32 MiB scoped limit.
    bytes_per_row = 2 * F * 4 + 2 * F * 2 + (H1 + H2) * 10 + 64
    tm_vmem = max(128, ((20 * 1024 * 1024) // bytes_per_row) // 128 * 128)
    tm = min(tm, tm_vmem)
    # Guarantee >= 2 grid steps so "parallel" semantics can use both v7x TensorCores.
    tm_half = max(128, _round_up(-(-B // 2), 128))
    return min(tm, tm_half)


def ranknet_forward(x, params, *, tm=8192):
    """x: [B, F] float32 (PyTorch layout). Returns scores of shape [B] (squeeze(1))."""
    w1, b1, w2, b2, w3, b3 = params          # PyTorch-native shapes ([out, in], [out])
    B, F = x.shape

    ew_dtype = _elementwise_dtype()
    tm = _choose_tile(B, F, tm)
    num_tiles = pl.cdiv(B, tm)
    b_pad = num_tiles * tm                   # only the *output* is padded (fresh alloc)

    x = x.astype(jnp.float32)                # no-op for f32 inputs; no relayout pass

    # Weights: bf16 for the MXU; biases in the elementwise dtype (broadcast columns).
    w1b = w1.astype(jnp.bfloat16)                                    # [H1, F]
    w2b = w2.astype(jnp.bfloat16)                                    # [H2, H1]
    w3p = (jnp.zeros((8, H2), jnp.float32)
           .at[0, :].set(w3.reshape(H2))
           .astype(jnp.bfloat16))                                    # [8, H2], row 0 real
    b1c = b1.reshape(H1, 1).astype(ew_dtype)                         # [H1, 1]
    b2c = b2.reshape(H2, 1).astype(ew_dtype)                         # [H2, 1]
    b3c = b3.reshape(1, 1).astype(jnp.float32)                       # [1, 1]

    flops = 2 * b_pad * (F * H1 + H1 * H2 + H2 * 8)
    bytes_accessed = (
        B * F * 4                                                    # f32 x stream (dominant)
        + w1b.size * 2 + w2b.size * 2 + w3p.size * 2
        + (b1c.size + b2c.size + b3c.size) * 4
        + b_pad * 4                                                  # f32 scores out
    )

    out = pl.pallas_call(
        ranknet_kernel,
        out_shape=jax.ShapeDtypeStruct((1, b_pad), jnp.float32),
        grid=(num_tiles,),
        in_specs=[
            pl.BlockSpec((tm, F), lambda i: (i, 0)),     # x, natural layout, pipelined
            pl.BlockSpec((H1, F), lambda i: (0, 0)),     # w1, resident in VMEM
            pl.BlockSpec((H1, 1), lambda i: (0, 0)),     # b1
            pl.BlockSpec((H2, H1), lambda i: (0, 0)),    # w2
            pl.BlockSpec((H2, 1), lambda i: (0, 0)),     # b2
            pl.BlockSpec((8, H2), lambda i: (0, 0)),     # w3 (zero-padded rows)
            pl.BlockSpec((1, 1), lambda i: (0, 0)),      # b3
        ],
        out_specs=pl.BlockSpec((1, tm), lambda i: (0, i)),   # lane-dense score slab
        compiler_params=pltpu.CompilerParams(
            dimension_semantics=("parallel",),           # megacore sharding on v7x
            vmem_limit_bytes=32 * 1024 * 1024,           # raise v5e's 16 MiB default
        ),
        cost_estimate=pl.CostEstimate(
            flops=flops, transcendentals=0, bytes_accessed=bytes_accessed),
    )(x, w1b, b1c, w2b, b2c, w3p, b3c)

    return out[0, :B]  # drop padded scores, squeeze(1) semantics


def init_params(key, num_features):
    """Deterministic init mirroring nn.Linear ([out, in] weights, [out] biases)."""
    k1, k2, k3, k4, k5, k6 = jax.random.split(key, 6)

    def linear(kw, kb, fan_in, fan_out):
        bound = 1.0 / jnp.sqrt(fan_in)
        w = jax.random.uniform(kw, (fan_out, fan_in), jnp.float32, -bound, bound)
        b = jax.random.uniform(kb, (fan_out,), jnp.float32, -bound, bound)
        return w, b

    w1, b1 = linear(k1, k2, num_features, H1)
    w2, b2 = linear(k3, k4, H1, H2)
    w3, b3 = linear(k5, k6, H2, 1)
    return (w1, b1, w2, b2, w3, b3)


def ranknet_ref(x, params, ew_dtype):
    """Pure-JAX reference applying the same quantization points as the kernel."""
    w1, b1, w2, b2, w3, b3 = params
    xb = x.astype(jnp.bfloat16)
    h1 = jnp.dot(xb, w1.astype(jnp.bfloat16).T, preferred_element_type=jnp.float32)
    h1 = jnp.maximum(h1.astype(ew_dtype) + b1.astype(ew_dtype), 0).astype(jnp.bfloat16)
    h2 = jnp.dot(h1, w2.astype(jnp.bfloat16).T, preferred_element_type=jnp.float32)
    h2 = jnp.maximum(h2.astype(ew_dtype) + b2.astype(ew_dtype), 0).astype(jnp.bfloat16)
    s = jnp.dot(h2, w3.astype(jnp.bfloat16).T, preferred_element_type=jnp.float32) + b3
    return s[:, 0]


if __name__ == "__main__":
    key = jax.random.PRNGKey(0)
    kx1, kx2, kx3, kp = jax.random.split(key, 4)

    F = 32
    params = init_params(kp, F)
    ew = _elementwise_dtype()

    # Small batch: single grid step, tile == batch.
    B1 = 8
    x1 = jax.random.normal(kx1, (B1, F), dtype=jnp.float32)
    s1 = jax.block_until_ready(ranknet_forward(x1, params))
    r1 = ranknet_ref(x1, params, ew)
    assert s1.shape == (B1,)
    assert jnp.allclose(s1, r1, atol=2e-3, rtol=2e-3), (s1, r1)

    # Multi-tile batch, exactly divisible: 2 grid steps (megacore path).
    B2 = 1024
    x2 = jax.random.normal(kx2, (B2, F), dtype=jnp.float32)
    s2 = jax.block_until_ready(ranknet_forward(x2, params))
    r2 = ranknet_ref(x2, params, ew)
    assert s2.shape == (B2,)
    assert jnp.allclose(s2, r2, atol=2e-3, rtol=2e-3), (s2, r2)

    # Ragged tail: last grid step reads a partial x block; padded scores dropped.
    B3 = 300
    x3 = jax.random.normal(kx3, (B3, F), dtype=jnp.float32)
    s3 = jax.block_until_ready(ranknet_forward(x3, params))
    r3 = ranknet_ref(x3, params, ew)
    assert s3.shape == (B3,)
    assert jnp.allclose(s3, r3, atol=2e-3, rtol=2e-3), (s3, r3)

    print("KERNEL_OK")
</pallas_src>

<mosaic_0001>
module attributes {stable_mosaic.version = 11 : i64} {
  func.func @ranknet_kernel(%arg0: i32, %arg1: memref<8x32xf32, #tpu.memory_space<vmem>>, %arg2: memref<64x32xbf16, #tpu.memory_space<vmem>>, %arg3: memref<64x1xf32, #tpu.memory_space<vmem>>, %arg4: memref<32x64xbf16, #tpu.memory_space<vmem>>, %arg5: memref<32x1xf32, #tpu.memory_space<vmem>>, %arg6: memref<8x32xbf16, #tpu.memory_space<vmem>>, %arg7: memref<1x1xf32, #tpu.memory_space<vmem>>, %arg8: memref<1x8xf32, #tpu.memory_space<vmem>>) attributes {dimension_semantics = [#tpu.dimension_semantics<parallel>], iteration_bounds = array<i64: 1>, scalar_prefetch = 0 : i64, scratch_operands = 0 : i64, tpu.core_type = #tpu.core_type<tc>, window_params = [{transform_indices = @transform_0, window_bounds = array<i64: 8, 32>}, {pipeline_mode = #tpu.pipeline_mode<synchronous>, transform_indices = @transform_1, window_bounds = array<i64: 64, 32>}, {pipeline_mode = #tpu.pipeline_mode<synchronous>, transform_indices = @transform_2, window_bounds = array<i64: 64, 1>}, {pipeline_mode = #tpu.pipeline_mode<synchronous>, transform_indices = @transform_3, window_bounds = array<i64: 32, 64>}, {pipeline_mode = #tpu.pipeline_mode<synchronous>, transform_indices = @transform_4, window_bounds = array<i64: 32, 1>}, {pipeline_mode = #tpu.pipeline_mode<synchronous>, transform_indices = @transform_5, window_bounds = array<i64: 8, 32>}, {pipeline_mode = #tpu.pipeline_mode<synchronous>, transform_indices = @transform_6, window_bounds = array<i64: 1, 1>}, {transform_indices = @transform_7, window_bounds = array<i64: 1, 8>}]} {
    %c0 = arith.constant 0 : index
    %c0_0 = arith.constant 0 : index
    %0 = vector.load %arg1[%c0, %c0_0] : memref<8x32xf32, #tpu.memory_space<vmem>>, vector<8x32xf32>
    %1 = arith.truncf %0 : vector<8x32xf32> to vector<8x32xbf16>
    %c0_1 = arith.constant 0 : index
    %c0_2 = arith.constant 0 : index
    %2 = vector.load %arg2[%c0_1, %c0_2] : memref<64x32xbf16, #tpu.memory_space<vmem>>, vector<64x32xbf16>
    %cst = arith.constant dense<0.000000e+00> : vector<64x8xf32>
    %3 = tpu.matmul %2, %1, %cst {dimension_numbers = #tpu.dot_dimension_numbers<[1], [1], [0], [0], [0, 0, 1, 0], [], []>} : vector<64x32xbf16>, vector<8x32xbf16>, vector<64x8xf32> -> vector<64x8xf32>
    %c0_3 = arith.constant 0 : index
    %c0_4 = arith.constant 0 : index
    %4 = vector.load %arg3[%c0_3, %c0_4] : memref<64x1xf32, #tpu.memory_space<vmem>>, vector<64x1xf32>
    %5 = vector.broadcast %4 : vector<64x1xf32> to vector<64x8xf32>
    %6 = arith.addf %3, %5 : vector<64x8xf32>
    %cst_5 = arith.constant 0.000000e+00 : f32
    %7 = vector.broadcast %cst_5 : f32 to vector<64x8xf32>
    %8 = arith.maximumf %6, %7 : vector<64x8xf32>
    %9 = arith.truncf %8 : vector<64x8xf32> to vector<64x8xbf16>
    %c0_6 = arith.constant 0 : index
    %c0_7 = arith.constant 0 : index
    %10 = vector.load %arg4[%c0_6, %c0_7] : memref<32x64xbf16, #tpu.memory_space<vmem>>, vector<32x64xbf16>
    %cst_8 = arith.constant dense<0.000000e+00> : vector<32x8xf32>
    %11 = tpu.matmul %10, %9, %cst_8 {dimension_numbers = #tpu.dot_dimension_numbers<[1], [0], [0], [1], [0, 0, 1, 1], [], []>} : vector<32x64xbf16>, vector<64x8xbf16>, vector<32x8xf32> -> vector<32x8xf32>
    %c0_9 = arith.constant 0 : index
    %c0_10 = arith.constant 0 : index
    %12 = vector.load %arg5[%c0_9, %c0_10] : memref<32x1xf32, #tpu.memory_space<vmem>>, vector<32x1xf32>
    %13 = vector.broadcast %12 : vector<32x1xf32> to vector<32x8xf32>
    %14 = arith.addf %11, %13 : vector<32x8xf32>
    %cst_11 = arith.constant 0.000000e+00 : f32
    %15 = vector.broadcast %cst_11 : f32 to vector<32x8xf32>
    %16 = arith.maximumf %14, %15 : vector<32x8xf32>
    %17 = arith.truncf %16 : vector<32x8xf32> to vector<32x8xbf16>
    %c0_12 = arith.constant 0 : index
    %c0_13 = arith.constant 0 : index
    %18 = vector.load %arg6[%c0_12, %c0_13] : memref<8x32xbf16, #tpu.memory_space<vmem>>, vector<8x32xbf16>
    %cst_14 = arith.constant dense<0.000000e+00> : vector<8x8xf32>
    %19 = tpu.matmul %18, %17, %cst_14 {dimension_numbers = #tpu.dot_dimension_numbers<[1], [0], [0], [1], [0, 0, 1, 1], [], []>} : vector<8x32xbf16>, vector<32x8xbf16>, vector<8x8xf32> -> vector<8x8xf32>
    %20 = vector.extract_strided_slice %19 {offsets = [0, 0], sizes = [1, 8], strides = [1, 1]} : vector<8x8xf32> to vector<1x8xf32>
    %c0_15 = arith.constant 0 : index
    %c0_16 = arith.constant 0 : index
    %21 = vector.load %arg7[%c0_15, %c0_16] : memref<1x1xf32, #tpu.memory_space<vmem>>, vector<1x1xf32>
    %22 = vector.broadcast %21 : vector<1x1xf32> to vector<1x8xf32>
    %23 = arith.addf %20, %22 : vector<1x8xf32>
    %c0_17 = arith.constant 0 : index
    %c0_18 = arith.constant 0 : index
    %24 = vector.load %arg8[%c0_17, %c0_18] : memref<1x8xf32, #tpu.memory_space<vmem>>, vector<1x8xf32>
    tpu.vector_store %arg8[%c0_17, %c0_18], %23 {strides = array<i32>} : memref<1x8xf32, #tpu.memory_space<vmem>>, vector<1x8xf32>,
    return
  }
  func.func @transform_0(%arg0: i32) -> (i32, i32) {
    %c0_i32 = arith.constant 0 : i32
    %c0_i32_0 = arith.constant 0 : i32
    return %arg0, %c0_i32 : i32, i32
  }
  func.func @transform_1(%arg0: i32) -> (i32, i32) {
    %c0_i32 = arith.constant 0 : i32
    %c0_i32_0 = arith.constant 0 : i32
    %c0_i32_1 = arith.constant 0 : i32
    return %c0_i32, %c0_i32_0 : i32, i32
  }
  func.func @transform_2(%arg0: i32) -> (i32, i32) {
    %c0_i32 = arith.constant 0 : i32
    %c0_i32_0 = arith.constant 0 : i32
    %c0_i32_1 = arith.constant 0 : i32
    return %c0_i32, %c0_i32_0 : i32, i32
  }
  func.func @transform_3(%arg0: i32) -> (i32, i32) {
    %c0_i32 = arith.constant 0 : i32
    %c0_i32_0 = arith.constant 0 : i32
    %c0_i32_1 = arith.constant 0 : i32
    return %c0_i32, %c0_i32_0 : i32, i32
  }
  func.func @transform_4(%arg0: i32) -> (i32, i32) {
    %c0_i32 = arith.constant 0 : i32
    %c0_i32_0 = arith.constant 0 : i32
    %c0_i32_1 = arith.constant 0 : i32
    return %c0_i32, %c0_i32_0 : i32, i32
  }
  func.func @transform_5(%arg0: i32) -> (i32, i32) {
    %c0_i32 = arith.constant 0 : i32
    %c0_i32_0 = arith.constant 0 : i32
    %c0_i32_1 = arith.constant 0 : i32
    return %c0_i32, %c0_i32_0 : i32, i32
  }
  func.func @transform_6(%arg0: i32) -> (i32, i32) {
    %c0_i32 = arith.constant 0 : i32
    %c0_i32_0 = arith.constant 0 : i32
    %c0_i32_1 = arith.constant 0 : i32
    return %c0_i32, %c0_i32_0 : i32, i32
  }
  func.func @transform_7(%arg0: i32) -> (i32, i32) {
    %c0_i32 = arith.constant 0 : i32
    %c0_i32_0 = arith.constant 0 : i32
    return %c0_i32, %arg0 : i32, i32
  }
}

</mosaic_0001>

<bundles_post_ra>
// kernel: tpu_custom_call.1
= control target key start
LH: loop header
LB: loop body
LE: loop exit
PB: predicated region body
PF: predicated region fallthrough
CT: control target
= control target key end

     0   :  { %s461_s0 = inlined_call_operand.vmem [shape: f32[8,32], index: 0, kind: input, shape index: {}]   ;;  %s462_s1 = inlined_call_operand.vmem [shape: bf16[64,32], index: 1, kind: input, shape index: {}]   ;;  %s463_s2 = inlined_call_operand.vmem [shape: f32[64,1], index: 2, kind: input, shape index: {}]   ;;  %s464_s3 = inlined_call_operand.vmem [shape: bf16[32,64], index: 3, kind: input, shape index: {}]   ;;  %s465_s4 = inlined_call_operand.vmem [shape: f32[32,1], index: 4, kind: input, shape index: {}]   ;;  %s466_s5 = inlined_call_operand.vmem [shape: bf16[8,32], index: 5, kind: input, shape index: {}]   ;;  %s467_s6 = inlined_call_operand.<no memory space> [shape: f32[1,1], index: 6, kind: input, shape index: {}]   ;;  %s468_s7 = inlined_call_operand.hbm [shape: f32[1,8], index: 7, kind: output, shape index: {}]  }
   0x1   :  { %v12_v0 = vstv %s467_s6 }
   0x2   :  { %13 = vst [vmem:[#allocation2] sm:$0x1] %v12_v0 }
   0x3   :  { %v30_v1 = vld [vmem:[%s461_s0] sm:$0xff]  ;;  %vm108_vm0 = vcmask 261120   ;;  %v46_v2 = vld [vmem:[%s463_s2 + $0x30] sm:$0xff]  ;;  %v347_v4 = vmov 0  }
   0x4   :  { %v31_v3 = vpack.c.bf16 %v30_v1, %v30_v1  ;;  %318 = vset.pattern.permute.xlu0 %v347_v4  ;;  %319 = vset.pattern.permute.xlu1 %v347_v4  ;;  %v44_v5 = vld [vmem:[%s463_s2 + $0x20] sm:$0xff]  ;;  %v42_v7 = vld [vmem:[%s463_s2 + $0x10] sm:$0xff] }
   0x5   :  { %80 = vperm.xlu0 %318, %v46_v2   ;;  %70 = vperm.xlu1 %319, %v44_v5   ;;  %v311_v8 = vld [vmem:[%s462_s1 + $0x10] sm:$0xff] }
   0x6   :  { %v122_v6 = vsel %vm108_vm0, %v31_v3, 0  ;;  %320 = vset.pattern.permute.xlu2 %v347_v4 }
   0x7   :  { %315 = vmatpush.bf16.xpose.msra.mxu3 %v122_v6  ;;  %131 = vmatpush.bf16.xpose.msra.mxu0 %v122_v6 }
   0x8   :  { %60 = vperm.xlu2 %320, %v42_v7  }
   0x9   :  { %14 = vsyncpa [#allocation4], 0  ;;  %v309_v9 = vld [vmem:[%s462_s1] sm:$0xff]  ;;  %v47_v10 = vld [vmem:[%s463_s2 + $0x38] sm:$0xff]  ;;  %vm203_vm1 = vcmask 523264   ;;  %s348_s12 = smov [#allocation3]  }
   0xa   :  { %v45_v11 = vld [vmem:[%s463_s2 + $0x28] sm:$0xff]  ;;  %v43_v12 = vld [vmem:[%s463_s2 + $0x18] sm:$0xff]  ;;  %v40_v13 = vld [vmem:[%s463_s2] sm:$0xff]  ;;  %s267_s13 = sshll.u32 %s348_s12, 4  ;;  %s269_s16 = sshll.u32 %s468_s7, 4  ;;  %vm260_vm2 = vcmask 57344   ;;  %s268_s13 = int_to_ptr.vmem [resolvable:$true] %s267_s13  ;;  %s270_s16 = int_to_ptr.hbm [resolvable:$true] %s269_s16 }
   0xb   :  { %v41_v14 = vld [vmem:[%s463_s2 + $0x8] sm:$0xff]  ;;  %v171_v15 = vld [vmem:[%s465_s4 + $0x10] sm:$0xff]  ;;  %v312_v16 = vld [vmem:[%s462_s1 + $0x18] sm:$0xff] }
   0xc   :  { %v310_v17 = vld [vmem:[%s462_s1 + $0x8] sm:$0xff]  ;;  %v172_v18 = vld [vmem:[%s465_s4 + $0x18] sm:$0xff]  ;;  %v169_v19 = vld [vmem:[%s465_s4] sm:$0xff] }
   0xd   :  { %85 = vperm.xlu0 %318, %v47_v10   ;;  %75 = vperm.xlu1 %319, %v45_v11   ;;  %v170_v20 = vld [vmem:[%s465_s4 + $0x8] sm:$0xff]  ;;  %v252_v21 = vld [vmem:[#allocation2] sm:$0x1] }
   0xe   :  { %296 = vmatmul.msk.bf16.vlgmr.msra.gmra.mxu3 %vm108_vm0, %v311_v8  ;;  %294 = vmatmul.msk.bf16.vlgmr.msra.gmra.mxu0 %vm108_vm0, %v309_v9  ;;  %v313_v58 = vld [vmem:[%s464_s3] sm:$0xff]  ;;  %v314_v59 = vld [vmem:[%s464_s3 + $0x8] sm:$0xff] }
  0x10   :  { %65 = vperm.xlu2 %320, %v43_v12  }
  0x15   :  { %50 = vperm.xlu0 %318, %v40_v13   ;;  %55 = vperm.xlu1 %319, %v41_v14   ;;  %v235_v14 = vld [vmem:[%s466_s5] sm:$0xf] }
  0x18   :  { %185 = vperm.xlu2 %320, %v171_v15  }
  0x1d   :  { %190 = vperm.xlu0 %318, %v172_v18   ;;  %175 = vperm.xlu1 %319, %v169_v19  }
  0x1e   :  { %297 = vmatmul.msk.bf16.gmra.mxu3 %vm108_vm0, %v312_v16  ;;  %295 = vmatmul.msk.bf16.gmra.mxu0 %vm108_vm0, %v310_v17 }
  0x20   :  { %180 = vperm.xlu2 %320, %v170_v20  }
  0x25   :  { %255 = vperm.xlu0 %318, %v252_v21  }
  0x62   :  { %v61_v30 = vpop.permute.xlu2 %60 }
  0x6a   :  { %v66_v41 = vpop.permute.xlu2 %65 }
  0x72   :  { %v186_v62 = vpop.permute.xlu2 %185 }
  0x77   :  { %v71_v26 = vpop.permute.xlu1 %70  ;;  %v81_v27 = vpop.permute.xlu0 %80 }
  0x7a   :  { %v181_v0 = vpop.permute.xlu2 %180 }
  0x7f   :  { %v76_v31 = vpop.permute.xlu1 %75  ;;  %v86_v32 = vpop.permute.xlu0 %85 }
  0x87   :  { %v56_v46 = vpop.permute.xlu1 %55  ;;  %v51_v47 = vpop.permute.xlu0 %50 }
  0x8b   :  { %v133_v22 = vpop.f32.mrf.mxu0 }
  0x8c   :  { %v134_v49 = vadd.f32 %v133_v22, %v51_v47 }
  0x8e   :  { %v153_v54 = vmax.f32 %v134_v49, 0.0 }
  0x8f   :  { %v191_v2 = vpop.permute.xlu0 %190  ;;  %v176_v6 = vpop.permute.xlu1 %175 }
  0x91   :  { %v143_v23 = vpop.f32.mrf.mxu3 }
  0x92   :  { %v144_v38 = vadd.f32 %v143_v23, %v71_v26 }
  0x93   :  { %v135_v24 = vpop.f32.mrf.mxu0 }
  0x94   :  { %v157_v48 = vmax.f32 %v144_v38, 0.0  ;;  %v136_v50 = vadd.f32 %v135_v24, %v56_v46 }
  0x96   :  { %v154_v55 = vmax.f32 %v136_v50, 0.0 }
  0x97   :  { %v256_v15 = vpop.permute.xlu0 %255 }
  0x98   :  { %v161_v57 = vpack.c.bf16 %v154_v55, %v153_v54  ;;  %v258_v16 = vperm.slane %v256_v15, 0 }
  0x99   :  { %v145_v25 = vpop.f32.mrf.mxu3 }
  0x9a   :  { %v146_v35 = vadd.f32 %v145_v25, %v76_v31 }
  0x9b   :  { %v138_v28 = vpop.f32.mrf.mxu0 }
  0x9c   :  { %v158_v42 = vmax.f32 %v146_v35, 0.0  ;;  %v139_v43 = vadd.f32 %v138_v28, %v61_v30 }
  0x9e   :  { %v155_v51 = vmax.f32 %v139_v43, 0.0  ;;  %v163_v53 = vpack.c.bf16 %v158_v42, %v157_v48 }
  0xa1   :  { %v148_v29 = vpop.f32.mrf.mxu3 }
  0xa2   :  { %v149_v33 = vadd.f32 %v148_v29, %v81_v27 }
  0xa3   :  { %v140_v37 = vpop.f32.mrf.mxu0 }
  0xa4   :  { %v159_v39 = vmax.f32 %v149_v33, 0.0  ;;  %v141_v44 = vadd.f32 %v140_v37, %v66_v41 }
  0xa6   :  { %v156_v52 = vmax.f32 %v141_v44, 0.0 }
  0xa8   :  { %v162_v56 = vpack.c.bf16 %v156_v52, %v155_v51 }
  0xa9   :  { %v150_v34 = vpop.f32.mrf.mxu3 }
  0xaa   :  { %v151_v36 = vadd.f32 %v150_v34, %v86_v32 }
  0xac   :  { %v160_v40 = vmax.f32 %v151_v36, 0.0 }
  0xae   :  { %v164_v45 = vpack.c.bf16 %v160_v40, %v159_v39 }
  0xb0   :  { %214 = vmatpush.bf16.msra.mxu1 %v164_v45 }
  0xb4   :  { %215 = vmatpush.bf16.msra.mxu1 %v163_v53 }
  0xb8   :  { %216 = vmatpush.bf16.msra.mxu1 %v162_v56 }
  0xbc   :  { %217 = vmatpush.bf16.msra.mxu1 %v161_v57 }
  0xbf   :  { %306 = vmatmul.msk.bf16.vlgmr.msra.gmra.mxu1 %vm203_vm1, %v313_v58 }
  0xcf   :  { %307 = vmatmul.msk.bf16.gmra.mxu1 %vm203_vm1, %v314_v59 }
 0x13c   :  { %v219_v60 = vpop.f32.mrf.mxu1 }
 0x13d   :  { %v220_v7 = vadd.f32 %v219_v60, %v176_v6 }
 0x13f   :  { %v229_v12 = vmax.f32 %v220_v7, 0.0 }
 0x144   :  { %v221_v61 = vpop.f32.mrf.mxu1 }
 0x145   :  { %v222_v4 = vadd.f32 %v221_v61, %v181_v0 }
 0x147   :  { %v230_v10 = vmax.f32 %v222_v4, 0.0 }
 0x149   :  { %v233_v13 = vpack.c.bf16 %v230_v10, %v229_v12 }
 0x14c   :  { %v224_v63 = vpop.f32.mrf.mxu1 }
 0x14d   :  { %v225_v1 = vadd.f32 %v224_v63, %v186_v62 }
 0x14f   :  { %v231_v8 = vmax.f32 %v225_v1, 0.0 }
 0x154   :  { %v226_v3 = vpop.f32.mrf.mxu1 }
 0x155   :  { %v227_v5 = vadd.f32 %v226_v3, %v191_v2 }
 0x157   :  { %v232_v9 = vmax.f32 %v227_v5, 0.0 }
 0x159   :  { %v234_v11 = vpack.c.bf16 %v232_v9, %v231_v8 }
 0x15b   :  { %245 = vmatpush.bf16.msra.mxu2 %v234_v11 }
 0x15f   :  { %246 = vmatpush.bf16.msra.mxu2 %v233_v13 }
 0x162   :  { %308 = vmatmul.msk.bf16.vlgmr.msra.gmra.mxu2 %vm108_vm0, %v235_v14 }
 0x1e5   :  { %v248_v17 = vpop.f32.mrf.mxu2 }
 0x1e6   :  { %v259_v18 = vadd.f32 %v258_v16, %v248_v17 }
 0x1e8   :  { %261 = vst.msk [vmem:[#allocation3] sm:$0x1] %vm260_vm2, %v259_v18 }
 0x1e9   :  { %272 = dma.vmem_to_hbm [thread:$0]  %s268_s13, 16, %s270_s16, [#allocation4]  }
 0x1ed   :  { %v250_v19 = vpop.f32.mrf.mxu2 }
 0x1ee   :  { %345 = dma.done.wait [#allocation4], 16  }
 0x1ef   :  { %346 = vsyncadd [#allocation4], 4294967280 }
 0x1f0   :  { %277 = vsyncpa [#allocation4], 1 }

</bundles_post_ra>
